<compile_context>
chip_gen: v5e
topology: v5e:2x2
jax: 0.10.0
libtpu: 0.0.40
codegen_flags: <defaults>
</compile_context>

<pallas_src>
import jax
import jax.numpy as jnp
from jax.experimental import pallas as pl
from jax.experimental.pallas import tpu as pltpu

ISZ = 7
NN = 100
OSZ = 1
BN_EPS = 1e-5

ISZ_PAD = 8     # lane-friendly padded input width
NN_PAD = 128    # padded hidden width (full 128-lane vreg)


def _inverse_linear(z):
    return 1.0 / (1.0 - z + jnp.abs(z)) + z + jnp.abs(z)


def _round_up(n, m):
    return pl.cdiv(n, m) * m


# -----------------------------------------------------------------------------
# Kernel
# -----------------------------------------------------------------------------
def mlp_kernel(
    x_ref,                      # (TILE_B, ISZ_PAD)   bf16
    w1_ref, b1_ref,             # (ISZ_PAD, NN_PAD) bf16 / (1, NN_PAD) f32  (BN folded)
    w2_ref, b2_ref,             # (NN_PAD, NN_PAD)  bf16 / (1, NN_PAD) f32  (BN folded)
    w3_ref, b3_ref,             # (NN_PAD, NN_PAD)  bf16 / (1, NN_PAD) f32  (BN folded)
    wab_ref, bab_ref,           # (NN_PAD, 2) bf16 / (1, 2) f32  (heads merged, *0.5 folded)
    out_ref,                    # (TILE_B, 2) f32
):
    x = x_ref[...]              # bf16

    # ---- lyrE1: Linear+BN folded, ReLU ----
    h1 = jnp.dot(x, w1_ref[...], preferred_element_type=jnp.float32) + b1_ref[...]
    h1 = jnp.maximum(h1, 0.0)

    # ---- lyrE2: Linear+BN folded, ReLU, Linear+BN folded ----
    h2 = jnp.dot(h1.astype(jnp.bfloat16), w2_ref[...],
                 preferred_element_type=jnp.float32) + b2_ref[...]
    h2 = jnp.maximum(h2, 0.0)
    h3 = jnp.dot(h2.astype(jnp.bfloat16), w3_ref[...],
                 preferred_element_type=jnp.float32) + b3_ref[...]

    # ---- residual + ReLU ----
    h = jnp.maximum(h1 + h3, 0.0)

    # ---- merged heads: z[:, 0] = a-head/2, z[:, 1] = b-head/2 ----
    z = jnp.dot(h.astype(jnp.bfloat16), wab_ref[...],
                preferred_element_type=jnp.float32) + bab_ref[...]

    out_ref[...] = jnp.clip(_inverse_linear(z), 0.01, 100.0)


# -----------------------------------------------------------------------------
# Parameters (PyTorch-default-style init) + wrapper-side folding/padding
# -----------------------------------------------------------------------------
def make_raw_params(key):
    """Deterministic PyTorch-default-style init. Weights stored transposed as
    [in_features, out_features]; biases as [1, out_features]. BN is at its
    __init__ state (gamma=1, beta=0, running_mean=0, running_var=1)."""
    ks = jax.random.split(key, 10)

    def linear(kw, kb, fan_in, fan_out):
        bound = 1.0 / jnp.sqrt(fan_in)
        w = jax.random.uniform(kw, (fan_in, fan_out), jnp.float32, -bound, bound)
        b = jax.random.uniform(kb, (1, fan_out), jnp.float32, -bound, bound)
        return w, b

    w1, b1 = linear(ks[0], ks[1], ISZ, NN)
    w2, b2 = linear(ks[2], ks[3], NN, NN)
    w3, b3 = linear(ks[4], ks[5], NN, NN)
    wa, ba = linear(ks[6], ks[7], NN, OSZ)
    wb, bb = linear(ks[8], ks[9], NN, OSZ)

    bn = dict(
        gamma=jnp.ones((1, NN), jnp.float32),
        beta=jnp.zeros((1, NN), jnp.float32),
        mean=jnp.zeros((1, NN), jnp.float32),
        var=jnp.ones((1, NN), jnp.float32),
    )
    return dict(w1=w1, b1=b1, w2=w2, b2=b2, w3=w3, b3=b3,
                wa=wa, ba=ba, wb=wb, bb=bb,
                bn1=dict(bn), bn2=dict(bn), bn3=dict(bn))


def fold_params(raw):
    """Fold eval-mode BatchNorm and the heads' /2 into weights/biases, pad to
    lane-aligned shapes, and cast matmul weights to bf16.
    Padded lanes/rows are exactly zero so results are unchanged."""

    def bn_scale_shift(bn):
        scale = bn["gamma"] / jnp.sqrt(bn["var"] + BN_EPS)      # (1, NN)
        shift = bn["beta"] - bn["mean"] * scale                 # (1, NN)
        return scale, shift

    def pad_w(w, rows, cols):
        out = jnp.zeros((rows, cols), jnp.float32)
        return out.at[: w.shape[0], : w.shape[1]].set(w)

    def pad_b(b, cols):
        out = jnp.zeros((1, cols), jnp.float32)
        return out.at[:, : b.shape[1]].set(b)

    s1, t1 = bn_scale_shift(raw["bn1"])
    s2, t2 = bn_scale_shift(raw["bn2"])
    s3, t3 = bn_scale_shift(raw["bn3"])

    # Linear -> BN(eval) fold: W' = W * scale (per out column), b' = b*scale + shift
    w1 = pad_w(raw["w1"] * s1, ISZ_PAD, NN_PAD).astype(jnp.bfloat16)
    b1 = pad_b(raw["b1"] * s1 + t1, NN_PAD)
    w2 = pad_w(raw["w2"] * s2, NN_PAD, NN_PAD).astype(jnp.bfloat16)
    b2 = pad_b(raw["b2"] * s2 + t2, NN_PAD)
    w3 = pad_w(raw["w3"] * s3, NN_PAD, NN_PAD).astype(jnp.bfloat16)
    b3 = pad_b(raw["b3"] * s3 + t3, NN_PAD)

    # Merge the two heads and fold the /2.
    wab = jnp.concatenate([raw["wa"], raw["wb"]], axis=1) * 0.5   # (NN, 2)
    bab = jnp.concatenate([raw["ba"], raw["bb"]], axis=1) * 0.5   # (1, 2)
    wab = pad_w(wab, NN_PAD, 2).astype(jnp.bfloat16)

    return dict(w1=w1, b1=b1, w2=w2, b2=b2, w3=w3, b3=b3, wab=wab, bab=bab)


# -----------------------------------------------------------------------------
# pallas_call wrapper
# -----------------------------------------------------------------------------
def mlp_forward(x, kp, *, tile_b=512):
    B = x.shape[0]
    # Keep the tile a multiple of 8 sublanes; don't over-tile tiny batches.
    tile_b = int(min(tile_b, _round_up(max(B, 1), 8)))
    b_pad = int(_round_up(B, tile_b))
    grid = (b_pad // tile_b,)

    xp = jnp.zeros((b_pad, ISZ_PAD), jnp.bfloat16)
    xp = xp.at[:B, :ISZ].set(x.astype(jnp.bfloat16))

    def const_spec(arr):
        # Weights/biases: same block every grid step -> stay VMEM-resident.
        return pl.BlockSpec(arr.shape, lambda i: (0, 0))

    out = pl.pallas_call(
        mlp_kernel,
        out_shape=jax.ShapeDtypeStruct((b_pad, 2), jnp.float32),
        grid=grid,
        in_specs=[
            pl.BlockSpec((tile_b, ISZ_PAD), lambda i: (i, 0)),
            const_spec(kp["w1"]), const_spec(kp["b1"]),
            const_spec(kp["w2"]), const_spec(kp["b2"]),
            const_spec(kp["w3"]), const_spec(kp["b3"]),
            const_spec(kp["wab"]), const_spec(kp["bab"]),
        ],
        out_specs=pl.BlockSpec((tile_b, 2), lambda i: (i, 0)),
        compiler_params=pltpu.CompilerParams(
            dimension_semantics=("parallel",),
        ),
    )(xp, kp["w1"], kp["b1"], kp["w2"], kp["b2"],
      kp["w3"], kp["b3"], kp["wab"], kp["bab"])

    a = out[:B, 0:1]
    b = out[:B, 1:2]
    return a, b


# -----------------------------------------------------------------------------
# Pure-JAX reference (unfolded, f32) for a sanity check
# -----------------------------------------------------------------------------
def mlp_reference(x, raw):
    def bn(h, p):
        scale = p["gamma"] / jnp.sqrt(p["var"] + BN_EPS)
        return (h - p["mean"]) * scale + p["beta"]

    h1 = jnp.maximum(bn(x @ raw["w1"] + raw["b1"], raw["bn1"]), 0.0)
    h2 = jnp.maximum(bn(h1 @ raw["w2"] + raw["b2"], raw["bn2"]), 0.0)
    h3 = bn(h2 @ raw["w3"] + raw["b3"], raw["bn3"])
    h = jnp.maximum(h1 + h3, 0.0)
    za = (h @ raw["wa"] + raw["ba"]) * 0.5
    zb = (h @ raw["wb"] + raw["bb"]) * 0.5
    a = jnp.clip(_inverse_linear(za), 0.01, 100.0)
    b = jnp.clip(_inverse_linear(zb), 0.01, 100.0)
    return a, b


if __name__ == "__main__":
    key = jax.random.PRNGKey(0)
    k_param, k_x = jax.random.split(key)

    raw = make_raw_params(k_param)
    kp = fold_params(raw)

    B = 8
    x = jax.random.normal(k_x, (B, ISZ), jnp.float32)

    a, b = jax.jit(mlp_forward)(x, kp)
    jax.block_until_ready((a, b))

    a_ref, b_ref = mlp_reference(x, raw)

    assert a.shape == (B, OSZ) and b.shape == (B, OSZ)
    assert bool(jnp.all((a >= 0.01) & (a <= 100.0)))
    assert bool(jnp.all((b >= 0.01) & (b <= 100.0)))
    # bf16 matmuls with f32 accumulation -> loose tolerance vs. f32 reference.
    assert bool(jnp.allclose(a, a_ref, rtol=5e-2, atol=2e-2)), "head a mismatch"
    assert bool(jnp.allclose(b, b_ref, rtol=5e-2, atol=2e-2)), "head b mismatch"

    print("KERNEL_OK")
</pallas_src>

<mosaic_0001>
module attributes {stable_mosaic.version = 11 : i64} {
  func.func @mlp_kernel(%arg0: i32, %arg1: memref<8x8xbf16, #tpu.memory_space<vmem>>, %arg2: memref<8x128xbf16, #tpu.memory_space<vmem>>, %arg3: memref<1x128xf32, #tpu.memory_space<vmem>>, %arg4: memref<128x128xbf16, #tpu.memory_space<vmem>>, %arg5: memref<1x128xf32, #tpu.memory_space<vmem>>, %arg6: memref<128x128xbf16, #tpu.memory_space<vmem>>, %arg7: memref<1x128xf32, #tpu.memory_space<vmem>>, %arg8: memref<128x2xbf16, #tpu.memory_space<vmem>>, %arg9: memref<1x2xf32, #tpu.memory_space<vmem>>, %arg10: memref<8x2xf32, #tpu.memory_space<vmem>>) attributes {dimension_semantics = [#tpu.dimension_semantics<parallel>], iteration_bounds = array<i64: 1>, scalar_prefetch = 0 : i64, scratch_operands = 0 : i64, tpu.core_type = #tpu.core_type<tc>, window_params = [{transform_indices = @transform_0, window_bounds = array<i64: 8, 8>}, {pipeline_mode = #tpu.pipeline_mode<synchronous>, transform_indices = @transform_1, window_bounds = array<i64: 8, 128>}, {pipeline_mode = #tpu.pipeline_mode<synchronous>, transform_indices = @transform_2, window_bounds = array<i64: 1, 128>}, {pipeline_mode = #tpu.pipeline_mode<synchronous>, transform_indices = @transform_3, window_bounds = array<i64: 128, 128>}, {pipeline_mode = #tpu.pipeline_mode<synchronous>, transform_indices = @transform_4, window_bounds = array<i64: 1, 128>}, {pipeline_mode = #tpu.pipeline_mode<synchronous>, transform_indices = @transform_5, window_bounds = array<i64: 128, 128>}, {pipeline_mode = #tpu.pipeline_mode<synchronous>, transform_indices = @transform_6, window_bounds = array<i64: 1, 128>}, {pipeline_mode = #tpu.pipeline_mode<synchronous>, transform_indices = @transform_7, window_bounds = array<i64: 128, 2>}, {pipeline_mode = #tpu.pipeline_mode<synchronous>, transform_indices = @transform_8, window_bounds = array<i64: 1, 2>}, {transform_indices = @transform_9, window_bounds = array<i64: 8, 2>}]} {
    %c0 = arith.constant 0 : index
    %c0_0 = arith.constant 0 : index
    %0 = vector.load %arg1[%c0, %c0_0] : memref<8x8xbf16, #tpu.memory_space<vmem>>, vector<8x8xbf16>
    %c0_1 = arith.constant 0 : index
    %c0_2 = arith.constant 0 : index
    %1 = vector.load %arg2[%c0_1, %c0_2] : memref<8x128xbf16, #tpu.memory_space<vmem>>, vector<8x128xbf16>
    %cst = arith.constant dense<0.000000e+00> : vector<8x128xf32>
    %2 = tpu.matmul %0, %1, %cst {dimension_numbers = #tpu.dot_dimension_numbers<[1], [0], [0], [1], [0, 0, 1, 1], [], []>} : vector<8x8xbf16>, vector<8x128xbf16>, vector<8x128xf32> -> vector<8x128xf32>
    %c0_3 = arith.constant 0 : index
    %c0_4 = arith.constant 0 : index
    %3 = vector.load %arg3[%c0_3, %c0_4] : memref<1x128xf32, #tpu.memory_space<vmem>>, vector<1x128xf32>
    %4 = vector.broadcast %3 : vector<1x128xf32> to vector<8x128xf32>
    %5 = arith.addf %2, %4 : vector<8x128xf32>
    %cst_5 = arith.constant 0.000000e+00 : f32
    %6 = vector.broadcast %cst_5 : f32 to vector<8x128xf32>
    %7 = arith.maximumf %5, %6 : vector<8x128xf32>
    %8 = arith.truncf %7 : vector<8x128xf32> to vector<8x128xbf16>
    %c0_6 = arith.constant 0 : index
    %c0_7 = arith.constant 0 : index
    %9 = vector.load %arg4[%c0_6, %c0_7] : memref<128x128xbf16, #tpu.memory_space<vmem>>, vector<128x128xbf16>
    %cst_8 = arith.constant dense<0.000000e+00> : vector<8x128xf32>
    %10 = tpu.matmul %8, %9, %cst_8 {dimension_numbers = #tpu.dot_dimension_numbers<[1], [0], [0], [1], [0, 0, 1, 1], [], []>} : vector<8x128xbf16>, vector<128x128xbf16>, vector<8x128xf32> -> vector<8x128xf32>
    %c0_9 = arith.constant 0 : index
    %c0_10 = arith.constant 0 : index
    %11 = vector.load %arg5[%c0_9, %c0_10] : memref<1x128xf32, #tpu.memory_space<vmem>>, vector<1x128xf32>
    %12 = vector.broadcast %11 : vector<1x128xf32> to vector<8x128xf32>
    %13 = arith.addf %10, %12 : vector<8x128xf32>
    %cst_11 = arith.constant 0.000000e+00 : f32
    %14 = vector.broadcast %cst_11 : f32 to vector<8x128xf32>
    %15 = arith.maximumf %13, %14 : vector<8x128xf32>
    %16 = arith.truncf %15 : vector<8x128xf32> to vector<8x128xbf16>
    %c0_12 = arith.constant 0 : index
    %c0_13 = arith.constant 0 : index
    %17 = vector.load %arg6[%c0_12, %c0_13] : memref<128x128xbf16, #tpu.memory_space<vmem>>, vector<128x128xbf16>
    %cst_14 = arith.constant dense<0.000000e+00> : vector<8x128xf32>
    %18 = tpu.matmul %16, %17, %cst_14 {dimension_numbers = #tpu.dot_dimension_numbers<[1], [0], [0], [1], [0, 0, 1, 1], [], []>} : vector<8x128xbf16>, vector<128x128xbf16>, vector<8x128xf32> -> vector<8x128xf32>
    %c0_15 = arith.constant 0 : index
    %c0_16 = arith.constant 0 : index
    %19 = vector.load %arg7[%c0_15, %c0_16] : memref<1x128xf32, #tpu.memory_space<vmem>>, vector<1x128xf32>
    %20 = vector.broadcast %19 : vector<1x128xf32> to vector<8x128xf32>
    %21 = arith.addf %18, %20 : vector<8x128xf32>
    %22 = arith.addf %7, %21 : vector<8x128xf32>
    %cst_17 = arith.constant 0.000000e+00 : f32
    %23 = vector.broadcast %cst_17 : f32 to vector<8x128xf32>
    %24 = arith.maximumf %22, %23 : vector<8x128xf32>
    %25 = arith.truncf %24 : vector<8x128xf32> to vector<8x128xbf16>
    %c0_18 = arith.constant 0 : index
    %c0_19 = arith.constant 0 : index
    %26 = vector.load %arg8[%c0_18, %c0_19] : memref<128x2xbf16, #tpu.memory_space<vmem>>, vector<128x2xbf16>
    %cst_20 = arith.constant dense<0.000000e+00> : vector<8x2xf32>
    %27 = tpu.matmul %25, %26, %cst_20 {dimension_numbers = #tpu.dot_dimension_numbers<[1], [0], [0], [1], [0, 0, 1, 1], [], []>} : vector<8x128xbf16>, vector<128x2xbf16>, vector<8x2xf32> -> vector<8x2xf32>
    %c0_21 = arith.constant 0 : index
    %c0_22 = arith.constant 0 : index
    %28 = vector.load %arg9[%c0_21, %c0_22] : memref<1x2xf32, #tpu.memory_space<vmem>>, vector<1x2xf32>
    %29 = vector.broadcast %28 : vector<1x2xf32> to vector<8x2xf32>
    %30 = arith.addf %27, %29 : vector<8x2xf32>
    %cst_23 = arith.constant 1.000000e+00 : f32
    %31 = vector.broadcast %cst_23 : f32 to vector<8x2xf32>
    %32 = arith.subf %31, %30 : vector<8x2xf32>
    %33 = math.absf %30 : vector<8x2xf32>
    %34 = arith.addf %32, %33 : vector<8x2xf32>
    %cst_24 = arith.constant 1.000000e+00 : f32
    %35 = vector.broadcast %cst_24 : f32 to vector<8x2xf32>
    %36 = arith.divf %35, %34 : vector<8x2xf32>
    %37 = arith.addf %36, %30 : vector<8x2xf32>
    %38 = math.absf %30 : vector<8x2xf32>
    %39 = arith.addf %37, %38 : vector<8x2xf32>
    %cst_25 = arith.constant 0.00999999977 : f32
    %cst_26 = arith.constant 1.000000e+02 : f32
    %40 = vector.broadcast %cst_25 : f32 to vector<8x2xf32>
    %41 = arith.maximumf %40, %39 : vector<8x2xf32>
    %42 = vector.broadcast %cst_26 : f32 to vector<8x2xf32>
    %43 = arith.minimumf %42, %41 : vector<8x2xf32>
    %c0_27 = arith.constant 0 : index
    %c0_28 = arith.constant 0 : index
    %44 = vector.load %arg10[%c0_27, %c0_28] : memref<8x2xf32, #tpu.memory_space<vmem>>, vector<8x2xf32>
    tpu.vector_store %arg10[%c0_27, %c0_28], %43 {strides = array<i32>} : memref<8x2xf32, #tpu.memory_space<vmem>>, vector<8x2xf32>,
    return
  }
  func.func @transform_0(%arg0: i32) -> (i32, i32) {
    %c0_i32 = arith.constant 0 : i32
    %c0_i32_0 = arith.constant 0 : i32
    return %arg0, %c0_i32 : i32, i32
  }
  func.func @transform_1(%arg0: i32) -> (i32, i32) {
    %c0_i32 = arith.constant 0 : i32
    %c0_i32_0 = arith.constant 0 : i32
    %c0_i32_1 = arith.constant 0 : i32
    return %c0_i32, %c0_i32_0 : i32, i32
  }
  func.func @transform_2(%arg0: i32) -> (i32, i32) {
    %c0_i32 = arith.constant 0 : i32
    %c0_i32_0 = arith.constant 0 : i32
    %c0_i32_1 = arith.constant 0 : i32
    return %c0_i32, %c0_i32_0 : i32, i32
  }
  func.func @transform_3(%arg0: i32) -> (i32, i32) {
    %c0_i32 = arith.constant 0 : i32
    %c0_i32_0 = arith.constant 0 : i32
    %c0_i32_1 = arith.constant 0 : i32
    return %c0_i32, %c0_i32_0 : i32, i32
  }
  func.func @transform_4(%arg0: i32) -> (i32, i32) {
    %c0_i32 = arith.constant 0 : i32
    %c0_i32_0 = arith.constant 0 : i32
    %c0_i32_1 = arith.constant 0 : i32
    return %c0_i32, %c0_i32_0 : i32, i32
  }
  func.func @transform_5(%arg0: i32) -> (i32, i32) {
    %c0_i32 = arith.constant 0 : i32
    %c0_i32_0 = arith.constant 0 : i32
    %c0_i32_1 = arith.constant 0 : i32
    return %c0_i32, %c0_i32_0 : i32, i32
  }
  func.func @transform_6(%arg0: i32) -> (i32, i32) {
    %c0_i32 = arith.constant 0 : i32
    %c0_i32_0 = arith.constant 0 : i32
    %c0_i32_1 = arith.constant 0 : i32
    return %c0_i32, %c0_i32_0 : i32, i32
  }
  func.func @transform_7(%arg0: i32) -> (i32, i32) {
    %c0_i32 = arith.constant 0 : i32
    %c0_i32_0 = arith.constant 0 : i32
    %c0_i32_1 = arith.constant 0 : i32
    return %c0_i32, %c0_i32_0 : i32, i32
  }
  func.func @transform_8(%arg0: i32) -> (i32, i32) {
    %c0_i32 = arith.constant 0 : i32
    %c0_i32_0 = arith.constant 0 : i32
    %c0_i32_1 = arith.constant 0 : i32
    return %c0_i32, %c0_i32_0 : i32, i32
  }
  func.func @transform_9(%arg0: i32) -> (i32, i32) {
    %c0_i32 = arith.constant 0 : i32
    %c0_i32_0 = arith.constant 0 : i32
    return %arg0, %c0_i32 : i32, i32
  }
}

</mosaic_0001>

<bundles_post_ra>
// kernel: mlp_forward.1
= control target key start
LH: loop header
LB: loop body
LE: loop exit
PB: predicated region body
PF: predicated region fallthrough
CT: control target
= control target key end

     0   :  { %14 = vsyncpa [#allocation3], 0  ;;  %s511_s12 = smov [#allocation2]   ;;  %s512_s14 = smov 64   ;;  %s636_s0 = inlined_call_operand.vmem [shape: bf16[8,8], index: 0, kind: input, shape index: {}]   ;;  %s637_s1 = inlined_call_operand.vmem [shape: bf16[8,128], index: 1, kind: input, shape index: {}]   ;;  %s638_s2 = inlined_call_operand.vmem [shape: f32[1,128], index: 2, kind: input, shape index: {}]   ;;  %s639_s3 = inlined_call_operand.vmem [shape: bf16[128,128], index: 3, kind: input, shape index: {}]   ;;  %s640_s4 = inlined_call_operand.vmem [shape: f32[1,128], index: 4, kind: input, shape index: {}]   ;;  %s641_s5 = inlined_call_operand.hbm [shape: bf16[128,128], index: 5, kind: input, shape index: {}]   ;;  %s642_s6 = inlined_call_operand.vmem [shape: f32[1,128], index: 6, kind: input, shape index: {}]   ;;  %s643_s7 = inlined_call_operand.vmem [shape: bf16[128,2], index: 7, kind: input, shape index: {}]   ;;  %s644_s8 = inlined_call_operand.vmem [shape: f32[1,2], index: 8, kind: input, shape index: {}]   ;;  %s645_s9 = inlined_call_operand.vmem [shape: f32[8,2], index: 9, kind: output, shape index: {}]  }
   0x1   :  { %s29_s11 = sshll.u32 %s641_s5, 4  ;;  %s31_s13 = sshll.u32 %s511_s12, 4  ;;  %s30_s11 = int_to_ptr.hbm [resolvable:$true] %s29_s11  ;;  %s32_s13 = int_to_ptr.vmem [resolvable:$true] %s31_s13 }
   0x2   :  { %s513_s15 = smov 4  }
   0x3   :  { %37 = dma.hbm_to_vmem [thread:$0]  %s30_s11, 1024, %s32_s13, [#allocation3], %s512_s14, %s512_s14, %s513_s15  }
   0x4   :  { %509 = dma.done.wait [#allocation3], 1024  }
   0x5   :  { %510 = vsyncadd [#allocation3], 4294966272  ;;  %vm59_vm0 = vcmask 1043456   ;;  %v50_v0 = vld [vmem:[%s637_s1] sm:$0xf]  ;;  %v459_v1 = vld [vmem:[%s639_s3 + $0x38] sm:$0xff] }
   0x6   :  { %v61_v2 = vsel %vm59_vm0, %v50_v0, 0  ;;  %v49_v3 = vld [vmem:[%s636_s0] sm:$0xf]  ;;  %vm55_vm1 = vcmask 64512   ;;  %146 = vmatpush.bf16.msra.mxu1 %v459_v1  ;;  %v458_v4 = vld [vmem:[%s639_s3 + $0x30] sm:$0xff]  ;;  %v457_v5 = vld [vmem:[%s639_s3 + $0x28] sm:$0xff] }
   0x7   :  { %70 = vmatpush.bf16.msra.mxu0 %v61_v2  ;;  %v456_v6 = vld [vmem:[%s639_s3 + $0x20] sm:$0xff]  ;;  %v455_v7 = vld [vmem:[%s639_s3 + $0x18] sm:$0xff]  ;;  %v454_v8 = vld [vmem:[%s639_s3 + $0x10] sm:$0xff]  ;;  %vm348_vm6 = vcmask 15360  }
   0x8   :  { %v453_v9 = vld [vmem:[%s639_s3 + $0x8] sm:$0xff]  ;;  %v452_v10 = vld [vmem:[%s639_s3] sm:$0xff]  ;;  %v467_v11 = vld [vmem:[#allocation2 + $0x38] sm:$0xff] }
   0x9   :  { %229 = vmatpush.bf16.msra.mxu2 %v467_v11  ;;  %v466_v12 = vld [vmem:[#allocation2 + $0x30] sm:$0xff]  ;;  %v465_v13 = vld [vmem:[#allocation2 + $0x28] sm:$0xff]  ;;  %v464_v14 = vld [vmem:[#allocation2 + $0x20] sm:$0xff] }
   0xa   :  { %355 = vmatmul.msk.bf16.vlgmr.msra.gmra.mxu0 %vm55_vm1, %v49_v3  ;;  %147 = vmatpush.bf16.msra.mxu1 %v458_v4  ;;  %v463_v15 = vld [vmem:[#allocation2 + $0x18] sm:$0xff]  ;;  %v462_v16 = vld [vmem:[#allocation2 + $0x10] sm:$0xff]  ;;  %v479_v17 = vld [vmem:[%s638_s2] ss:$0 sm:$0xff] }
   0xb   :  { %v461_v23 = vld [vmem:[#allocation2 + $0x8] sm:$0xff]  ;;  %v460_v24 = vld [vmem:[#allocation2] sm:$0xff]  ;;  %v475_v25 = vld [vmem:[%s643_s7 + $0x38] sm:$0xff] }
   0xc   :  { %313 = vmatpush.bf16.msra.mxu3 %v475_v25  ;;  %v474_v26 = vld [vmem:[%s643_s7 + $0x30] sm:$0xff]  ;;  %v473_v27 = vld [vmem:[%s643_s7 + $0x28] sm:$0xff]  ;;  %v472_v28 = vld [vmem:[%s643_s7 + $0x20] sm:$0xff] }
   0xd   :  { %230 = vmatpush.bf16.msra.mxu2 %v466_v12  ;;  %v471_v29 = vld [vmem:[%s643_s7 + $0x18] sm:$0xff]  ;;  %v470_v30 = vld [vmem:[%s643_s7 + $0x10] sm:$0xff]  ;;  %v480_v31 = vld [vmem:[%s640_s4] ss:$0 sm:$0xff] }
   0xe   :  { %148 = vmatpush.bf16.msra.mxu1 %v457_v5  ;;  %v469_v37 = vld [vmem:[%s643_s7 + $0x8] sm:$0xff]  ;;  %v468_v38 = vld [vmem:[%s643_s7] sm:$0xff] }
   0xf   :  { %v481_v39 = vld [vmem:[%s642_s6] ss:$0 sm:$0xff] }
  0x10   :  { %314 = vmatpush.bf16.msra.mxu3 %v474_v26  ;;  %v482_v46 = vld [vmem:[%s644_s8] ss:$0 sm:$0xff] }
  0x11   :  { %231 = vmatpush.bf16.msra.mxu2 %v465_v13 }
  0x12   :  { %149 = vmatpush.bf16.msra.mxu1 %v456_v6 }
  0x14   :  { %315 = vmatpush.bf16.msra.mxu3 %v473_v27 }
  0x15   :  { %232 = vmatpush.bf16.msra.mxu2 %v464_v14 }
  0x16   :  { %150 = vmatpush.bf16.msra.mxu1 %v455_v7 }
  0x18   :  { %316 = vmatpush.bf16.msra.mxu3 %v472_v28 }
  0x19   :  { %233 = vmatpush.bf16.msra.mxu2 %v463_v15 }
  0x1a   :  { %151 = vmatpush.bf16.msra.mxu1 %v454_v8 }
  0x1c   :  { %317 = vmatpush.bf16.msra.mxu3 %v471_v29 }
  0x1d   :  { %234 = vmatpush.bf16.msra.mxu2 %v462_v16 }
  0x1e   :  { %152 = vmatpush.bf16.msra.mxu1 %v453_v9 }
  0x20   :  { %318 = vmatpush.bf16.msra.mxu3 %v470_v30 }
  0x21   :  { %235 = vmatpush.bf16.msra.mxu2 %v461_v23 }
  0x22   :  { %153 = vmatpush.bf16.msra.mxu1 %v452_v10 }
  0x24   :  { %319 = vmatpush.bf16.msra.mxu3 %v469_v37 }
  0x25   :  { %236 = vmatpush.bf16.msra.mxu2 %v460_v24 }
  0x28   :  { %320 = vmatpush.bf16.msra.mxu3 %v468_v38 }
  0x87   :  { %v72_v18 = vpop.f32.mrf.mxu0 }
  0x88   :  { %v73_v19 = vadd.f32 %v479_v17, %v72_v18 }
  0x8a   :  { %v76_v20 = vmax.f32 %v73_v19, 0.0 }
  0x8c   :  { %v77_v21 = vpack.c.bf16 %v76_v20, %v76_v20 }
  0x8e   :  { %154 = vmatmul.bf16.vlgmr.msra.gmra.mxu1 %v77_v21 }
  0x8f   :  { %v74_v22 = vpop.f32.mrf.mxu0 }
 0x10b   :  { %v155_v32 = vpop.f32.mrf.mxu1 }
 0x10c   :  { %v156_v33 = vadd.f32 %v480_v31, %v155_v32 }
 0x10e   :  { %v159_v34 = vmax.f32 %v156_v33, 0.0 }
 0x110   :  { %v160_v35 = vpack.c.bf16 %v159_v34, %v159_v34 }
 0x112   :  { %237 = vmatmul.bf16.vlgmr.msra.gmra.mxu2 %v160_v35 }
 0x113   :  { %v157_v36 = vpop.f32.mrf.mxu1 }
 0x195   :  { %v238_v40 = vpop.f32.mrf.mxu2 }
 0x196   :  { %v239_v41 = vadd.f32 %v481_v39, %v238_v40 }
 0x198   :  { %v242_v42 = vadd.f32 %v239_v41, %v76_v20 }
 0x19a   :  { %v243_v43 = vmax.f32 %v242_v42, 0.0 }
 0x19c   :  { %v244_v44 = vpack.c.bf16 %v243_v43, %v243_v43 }
 0x19d   :  { %v240_v45 = vpop.f32.mrf.mxu2 }
 0x19e   :  { %321 = vmatmul.bf16.vlgmr.msra.gmra.mxu3 %v244_v44 }
 0x221   :  { %v322_v47 = vpop.f32.mrf.mxu3 }
 0x222   :  { %v323_v48 = vadd.f32 %v482_v46, %v322_v47 }
 0x224   :  { %v326_v49 = vsub.f32 1.0, %v323_v48  ;;  %v327_v50 = vand.u32 2147483647, %v323_v48 }
 0x226   :  { %v328_v51 = vadd.f32 %v327_v50, %v326_v49 }
 0x228   :  { %483 = vrcp.f32 %v328_v51  ;;  %v340_v56 = vand.u32 2147483648, %v328_v51  ;;  %v338_v58 = vand.u32 2147483647, %v328_v51  ;;  %vm334_vm3 = vweird.f32 %v328_v51 }
 0x229   :  { %v324_v52 = vpop.f32.mrf.mxu3 }
 0x22a   :  { %v341_v60 = vor.u32 1.1754944e-38, %v340_v56  ;;  %vm339_vm5 = vcmp.eq.f32.partialorder %v338_v58, 8.507059e+37 }
 0x22e   :  { %v484_v53 = vpop.eup %483 }
 0x22f   :  { %v330_v54 = vmul.f32 %v484_v53, %v328_v51  ;;  %vm335_vm2 = vweird.f32 %v484_v53 }
 0x230   :  { %vm336_vm4 = vmor %vm334_vm3, %vm335_vm2 }
 0x231   :  { %v331_v55 = vsub.f32 1.0, %v330_v54 }
 0x233   :  { %v332_v57 = vmul.f32 %v484_v53, %v331_v55 }
 0x235   :  { %v333_v59 = vadd.f32 %v484_v53, %v332_v57 }
 0x237   :  { %v337_v61 = vsel %vm336_vm4, %v484_v53, %v333_v59 }
 0x238   :  { %v342_v62 = vsel %vm339_vm5, %v341_v60, %v337_v61 }
 0x239   :  { %v344_v63 = vadd.f32 %v342_v62, %v323_v48 }
 0x23b   :  { %v345_v0 = vadd.f32 %v344_v63, %v327_v50 }
 0x23d   :  { %v346_v1 = vmax.f32 %v345_v0, 0.01 }
 0x23f   :  { %v347_v2 = vmin.f32 %v346_v1, 100.0 }
 0x241   :  { %349 = vst.msk [vmem:[%s645_s9] sm:$0xff] %vm348_vm6, %v347_v2 }
 0x242   :  { %354 = vsyncpa [#allocation3], 1 }

</bundles_post_ra>
